<compile_context>
chip_gen: v5e
topology: v5e:2x2
jax: 0.10.0
libtpu: 0.0.40
codegen_flags: <defaults>
</compile_context>

<pallas_src>
import functools

import jax
import jax.numpy as jnp
from jax import lax
from jax.experimental import pallas as pl
from jax.experimental.pallas import tpu as pltpu

LEAKY_SLOPE = 0.01   # nn.LeakyReLU() default negative_slope
BN_EPS = 1e-5        # nn.BatchNorm2d default eps


def _leaky_relu(x):
    return jnp.where(x >= 0, x, LEAKY_SLOPE * x)


def _round_up(x, m):
    return (x + m - 1) // m * m


def resnet_block_kernel(x_ref, coords_ref, wa_ref, sha_ref, w2_ref, sh2_ref,
                        out_ref, *, H, W, Cin, Cout, CIP, COP):
    """One batch element per grid step.

    x_ref      : (1, Cin, H*W)   input image: channels on sublanes, pixels on lanes
    coords_ref : (2, H*W)        row 0 = y coordinate, row 1 = x coordinate per pixel
    wa_ref     : (2*COP, 9*CIP)  conv1 rows [0, COP) + shortcut rows [COP, 2*COP),
                                 BN scale folded in, K laid out tap-major
    sha_ref    : (2*COP, 1)      folded per-channel shifts for conv1 / shortcut
    w2_ref     : (COP, 9*COP)    conv2 weights, BN scale folded in
    sh2_ref    : (COP, 1)        folded per-channel shift for conv2
    out_ref    : (1, Cout, H*W)
    """
    HW = H * W

    xv = x_ref[0]                                           # (Cin, HW)
    if CIP > Cin:                                           # pad channels to sublane multiple
        xv = jnp.concatenate(
            [xv, jnp.zeros((CIP - Cin, HW), jnp.float32)], axis=0)

    # boundary masks over the flattened spatial (lane) axis, computed once
    coords = coords_ref[...]
    yy = coords[0:1, :]                                     # (1, HW)
    xx = coords[1:2, :]                                     # (1, HW)
    not_top = yy >= 1
    not_bot = yy < (H - 1)
    not_left = xx >= 1
    not_right = xx < (W - 1)

    def im2col(a):
        """a: (C, HW) -> (9*C, HW): the 9 shifted/masked taps stacked along sublanes."""
        pieces = []
        for ky in range(3):
            for kx in range(3):
                off = (ky - 1) * W + (kx - 1)               # flat-index offset of this tap
                piece = a if off == 0 else jnp.roll(a, shift=-off, axis=1)
                mask = None
                for cond, use in ((not_top, ky == 0), (not_bot, ky == 2),
                                  (not_left, kx == 0), (not_right, kx == 2)):
                    if use:
                        mask = cond if mask is None else (mask & cond)
                if mask is not None:
                    piece = jnp.where(mask, piece, 0.0)     # zero-padding at the border
                pieces.append(piece)
        return jnp.concatenate(pieces, axis=0)

    # ---- conv1 (+ fused shortcut 1x1) as a single lane-dense matmul ----
    ya = jnp.dot(wa_ref[...], im2col(xv),
                 preferred_element_type=jnp.float32) + sha_ref[...]
    h1 = _leaky_relu(ya[:COP])          # BN1 + bias folded; padded rows stay exactly 0
    sc = ya[COP:]                       # shortcut branch (BN_s folded)

    # ---- conv2 as a single lane-dense matmul ----
    y2 = jnp.dot(w2_ref[...], im2col(h1),
                 preferred_element_type=jnp.float32) + sh2_ref[...]

    # ---- residual add + LeakyReLU ----
    out = _leaky_relu(y2 + sc)
    out_ref[0] = out[:Cout]


def _bn_scale_shift(gamma, beta, mean, var):
    scale = gamma / jnp.sqrt(var + BN_EPS)
    shift = beta - mean * scale
    return scale, shift


@jax.jit
def resnet_block(x_nchw, params):
    """x_nchw: (N, Cin, H, W) float32. Returns (N, Cout, H, W) float32."""
    N, Cin, H, W = x_nchw.shape
    Cout = params["b1"].shape[0]
    HW = H * W
    CIP = _round_up(Cin, 8)     # input-channel rows padded to a sublane multiple
    COP = _round_up(Cout, 8)    # output-channel rows padded to a sublane multiple
    f32 = jnp.float32

    s1, t1 = _bn_scale_shift(params["bn1_g"], params["bn1_b"],
                             params["bn1_m"], params["bn1_v"])
    s2, t2 = _bn_scale_shift(params["bn2_g"], params["bn2_b"],
                             params["bn2_m"], params["bn2_v"])
    ss, ts = _bn_scale_shift(params["bns_g"], params["bns_b"],
                             params["bns_m"], params["bns_v"])

    # conv1 weights with BN1 scale folded; K laid out tap-major: k = (ky*3+kx)*CIP + c
    w1f = params["w1"].astype(f32) * s1[:, None, None, None]           # (Cout, Cin, 3, 3)
    w1f = jnp.pad(w1f, ((0, COP - Cout), (0, CIP - Cin), (0, 0), (0, 0)))
    w1k = jnp.transpose(w1f, (0, 2, 3, 1)).reshape(COP, 9 * CIP)

    # shortcut 1x1 weights (BN_s scale folded) live in the centre-tap columns
    wsf = params["ws"][:, :, 0, 0].astype(f32) * ss[:, None]           # (Cout, Cin)
    wsf = jnp.pad(wsf, ((0, COP - Cout), (0, CIP - Cin)))
    wsk = jnp.pad(wsf, ((0, 0), (4 * CIP, 4 * CIP)))                   # (COP, 9*CIP)

    wa = jnp.concatenate([w1k, wsk], axis=0)                           # (2*COP, 9*CIP)
    sha = jnp.concatenate([
        jnp.pad(s1 * params["b1"] + t1, (0, COP - Cout)),
        jnp.pad(ts, (0, COP - Cout)),
    ]).reshape(2 * COP, 1).astype(f32)

    # conv2 weights with BN2 scale folded
    w2f = params["w2"].astype(f32) * s2[:, None, None, None]           # (Cout, Cout, 3, 3)
    w2f = jnp.pad(w2f, ((0, COP - Cout), (0, COP - Cout), (0, 0), (0, 0)))
    w2k = jnp.transpose(w2f, (0, 2, 3, 1)).reshape(COP, 9 * COP)
    sh2 = jnp.pad(s2 * params["b2"] + t2, (0, COP - Cout)).reshape(COP, 1).astype(f32)

    # per-pixel (y, x) coordinates for the in-kernel boundary masks (shape-only constant)
    flat = jnp.arange(HW, dtype=jnp.int32)
    coords = jnp.stack([flat // W, flat % W]).astype(jnp.int32)        # (2, HW)

    x3 = x_nchw.astype(f32).reshape(N, Cin, HW)   # free reshape: NCHW is contiguous

    kernel = functools.partial(resnet_block_kernel, H=H, W=W, Cin=Cin,
                               Cout=Cout, CIP=CIP, COP=COP)

    out = pl.pallas_call(
        kernel,
        out_shape=jax.ShapeDtypeStruct((N, Cout, HW), f32),
        grid=(N,),
        in_specs=[
            pl.BlockSpec((1, Cin, HW), lambda n: (n, 0, 0)),      # per-image block
            pl.BlockSpec((2, HW), lambda n: (0, 0)),              # coords, resident
            pl.BlockSpec((2 * COP, 9 * CIP), lambda n: (0, 0)),   # fused conv1+shortcut W
            pl.BlockSpec((2 * COP, 1), lambda n: (0, 0)),         # fused shifts
            pl.BlockSpec((COP, 9 * COP), lambda n: (0, 0)),       # conv2 W
            pl.BlockSpec((COP, 1), lambda n: (0, 0)),             # conv2 shift
        ],
        out_specs=pl.BlockSpec((1, Cout, HW), lambda n: (n, 0, 0)),
        compiler_params=pltpu.CompilerParams(
            dimension_semantics=("parallel",)),
    )(x3, coords, wa, sha, w2k, sh2)

    return out.reshape(N, Cout, H, W)


def make_params(key, input_features, nb_features):
    ks = jax.random.split(key, 12)
    p = {
        "w1": 0.1 * jax.random.normal(ks[0], (nb_features, input_features, 3, 3), jnp.float32),
        "b1": 0.1 * jax.random.normal(ks[1], (nb_features,), jnp.float32),
        "w2": 0.1 * jax.random.normal(ks[2], (nb_features, nb_features, 3, 3), jnp.float32),
        "b2": 0.1 * jax.random.normal(ks[3], (nb_features,), jnp.float32),
        "ws": 0.1 * jax.random.normal(ks[4], (nb_features, input_features, 1, 1), jnp.float32),
        # BatchNorm params / running stats (inference mode)
        "bn1_g": 1.0 + 0.1 * jax.random.normal(ks[5], (nb_features,), jnp.float32),
        "bn1_b": 0.1 * jax.random.normal(ks[6], (nb_features,), jnp.float32),
        "bn1_m": 0.1 * jax.random.normal(ks[7], (nb_features,), jnp.float32),
        "bn1_v": jnp.abs(1.0 + 0.1 * jax.random.normal(ks[8], (nb_features,), jnp.float32)),
        "bn2_g": 1.0 + 0.05 * jax.random.normal(ks[9], (nb_features,), jnp.float32),
        "bn2_b": jnp.zeros((nb_features,), jnp.float32),
        "bn2_m": jnp.zeros((nb_features,), jnp.float32),
        "bn2_v": jnp.ones((nb_features,), jnp.float32),
        "bns_g": 1.0 + 0.05 * jax.random.normal(ks[10], (nb_features,), jnp.float32),
        "bns_b": 0.05 * jax.random.normal(ks[11], (nb_features,), jnp.float32),
        "bns_m": jnp.zeros((nb_features,), jnp.float32),
        "bns_v": jnp.ones((nb_features,), jnp.float32),
    }
    return p


def _reference(x_nchw, params):
    """Pure-JAX reference (lax.conv) for validation."""
    x = jnp.transpose(x_nchw, (0, 2, 3, 1))
    dn = ("NHWC", "HWIO", "NHWC")

    def conv(x, w_oihw, pad):
        w = jnp.transpose(w_oihw, (2, 3, 1, 0))
        return lax.conv_general_dilated(x, w, (1, 1), pad, dimension_numbers=dn)

    s1, t1 = _bn_scale_shift(params["bn1_g"], params["bn1_b"], params["bn1_m"], params["bn1_v"])
    s2, t2 = _bn_scale_shift(params["bn2_g"], params["bn2_b"], params["bn2_m"], params["bn2_v"])
    ss, ts = _bn_scale_shift(params["bns_g"], params["bns_b"], params["bns_m"], params["bns_v"])

    h = conv(x, params["w1"], "SAME") + params["b1"]
    h = h * s1 + t1
    h = jnp.where(h >= 0, h, LEAKY_SLOPE * h)
    h = conv(h, params["w2"], "SAME") + params["b2"]
    h = h * s2 + t2
    sc = conv(x, params["ws"], "SAME") * ss + ts
    y = h + sc
    y = jnp.where(y >= 0, y, LEAKY_SLOPE * y)
    return jnp.transpose(y, (0, 3, 1, 2))


if __name__ == "__main__":
    key = jax.random.PRNGKey(0)
    k_x, k_p = jax.random.split(key)

    N, Cin, H, W = 2, 4, 16, 16
    nb_features = 6

    x = jax.random.normal(k_x, (N, Cin, H, W), jnp.float32)
    params = make_params(k_p, Cin, nb_features)

    out = jax.block_until_ready(resnet_block(x, params))
    ref = jax.block_until_ready(_reference(x, params))

    assert out.shape == (N, nb_features, H, W)
    assert jnp.allclose(out, ref, atol=1e-4, rtol=1e-4), float(jnp.max(jnp.abs(out - ref)))

    print("KERNEL_OK")
</pallas_src>

<mosaic_0001>
module attributes {stable_mosaic.version = 11 : i64} {
  func.func @resnet_block_kernel(%arg0: i32, %arg1: memref<1x4x256xf32, #tpu.memory_space<vmem>>, %arg2: memref<2x256xi32, #tpu.memory_space<vmem>>, %arg3: memref<16x72xf32, #tpu.memory_space<vmem>>, %arg4: memref<16x1xf32, #tpu.memory_space<vmem>>, %arg5: memref<8x72xf32, #tpu.memory_space<vmem>>, %arg6: memref<8x1xf32, #tpu.memory_space<vmem>>, %arg7: memref<1x6x256xf32, #tpu.memory_space<vmem>>) attributes {dimension_semantics = [#tpu.dimension_semantics<parallel>], iteration_bounds = array<i64: 2>, scalar_prefetch = 0 : i64, scratch_operands = 0 : i64, tpu.core_type = #tpu.core_type<tc>, window_params = [{transform_indices = @transform_0, window_bounds = array<i64: 1, 4, 256>}, {pipeline_mode = #tpu.pipeline_mode<synchronous>, transform_indices = @transform_1, window_bounds = array<i64: 2, 256>}, {pipeline_mode = #tpu.pipeline_mode<synchronous>, transform_indices = @transform_2, window_bounds = array<i64: 16, 72>}, {pipeline_mode = #tpu.pipeline_mode<synchronous>, transform_indices = @transform_3, window_bounds = array<i64: 16, 1>}, {pipeline_mode = #tpu.pipeline_mode<synchronous>, transform_indices = @transform_4, window_bounds = array<i64: 8, 72>}, {pipeline_mode = #tpu.pipeline_mode<synchronous>, transform_indices = @transform_5, window_bounds = array<i64: 8, 1>}, {transform_indices = @transform_6, window_bounds = array<i64: 1, 6, 256>}]} {
    %c0 = arith.constant 0 : index
    %c0_0 = arith.constant 0 : index
    %c0_1 = arith.constant 0 : index
    %0 = vector.load %arg1[%c0, %c0_0, %c0_1] : memref<1x4x256xf32, #tpu.memory_space<vmem>>, vector<1x4x256xf32>
    %1 = vector.shape_cast %0 : vector<1x4x256xf32> to vector<4x256xf32>
    %cst = arith.constant 0.000000e+00 : f32
    %2 = vector.broadcast %cst : f32 to vector<4x256xf32>
    %3 = tpu.concatenate %1, %2 in 0 : vector<4x256xf32>, vector<4x256xf32> -> vector<8x256xf32>
    %c0_2 = arith.constant 0 : index
    %c0_3 = arith.constant 0 : index
    %4 = vector.load %arg2[%c0_2, %c0_3] : memref<2x256xi32, #tpu.memory_space<vmem>>, vector<2x256xi32>
    %5 = vector.extract_strided_slice %4 {offsets = [0, 0], sizes = [1, 256], strides = [1, 1]} : vector<2x256xi32> to vector<1x256xi32>
    %6 = vector.extract_strided_slice %4 {offsets = [1, 0], sizes = [1, 256], strides = [1, 1]} : vector<2x256xi32> to vector<1x256xi32>
    %c1_i32 = arith.constant 1 : i32
    %7 = vector.broadcast %c1_i32 : i32 to vector<1x256xi32>
    %8 = arith.cmpi sge, %5, %7 : vector<1x256xi32>
    %c15_i32 = arith.constant 15 : i32
    %9 = vector.broadcast %c15_i32 : i32 to vector<1x256xi32>
    %10 = arith.cmpi slt, %5, %9 : vector<1x256xi32>
    %c1_i32_4 = arith.constant 1 : i32
    %11 = vector.broadcast %c1_i32_4 : i32 to vector<1x256xi32>
    %12 = arith.cmpi sge, %6, %11 : vector<1x256xi32>
    %c15_i32_5 = arith.constant 15 : i32
    %13 = vector.broadcast %c15_i32_5 : i32 to vector<1x256xi32>
    %14 = arith.cmpi slt, %6, %13 : vector<1x256xi32>
    %c0_6 = arith.constant 0 : index
    %c0_7 = arith.constant 0 : index
    %15 = vector.load %arg3[%c0_6, %c0_7] : memref<16x72xf32, #tpu.memory_space<vmem>>, vector<16x72xf32>
    %16 = vector.extract_strided_slice %3 {offsets = [0, 239], sizes = [8, 17], strides = [1, 1]} : vector<8x256xf32> to vector<8x17xf32>
    %17 = vector.extract_strided_slice %3 {offsets = [0, 0], sizes = [8, 239], strides = [1, 1]} : vector<8x256xf32> to vector<8x239xf32>
    %18 = tpu.concatenate %16, %17 in 1 : vector<8x17xf32>, vector<8x239xf32> -> vector<8x256xf32>
    %19 = arith.andi %8, %12 : vector<1x256xi1>
    %cst_8 = arith.constant 0.000000e+00 : f32
    %20 = vector.shape_cast %19 : vector<1x256xi1> to vector<1x256xi1>
    %21 = vector.broadcast %20 : vector<1x256xi1> to vector<8x256xi1>
    %22 = vector.broadcast %cst_8 : f32 to vector<8x256xf32>
    %23 = arith.select %21, %18, %22 : vector<8x256xi1>, vector<8x256xf32>
    %24 = vector.extract_strided_slice %3 {offsets = [0, 240], sizes = [8, 16], strides = [1, 1]} : vector<8x256xf32> to vector<8x16xf32>
    %25 = vector.extract_strided_slice %3 {offsets = [0, 0], sizes = [8, 240], strides = [1, 1]} : vector<8x256xf32> to vector<8x240xf32>
    %26 = tpu.concatenate %24, %25 in 1 : vector<8x16xf32>, vector<8x240xf32> -> vector<8x256xf32>
    %cst_9 = arith.constant 0.000000e+00 : f32
    %27 = vector.shape_cast %8 : vector<1x256xi1> to vector<1x256xi1>
    %28 = vector.broadcast %27 : vector<1x256xi1> to vector<8x256xi1>
    %29 = vector.broadcast %cst_9 : f32 to vector<8x256xf32>
    %30 = arith.select %28, %26, %29 : vector<8x256xi1>, vector<8x256xf32>
    %31 = vector.extract_strided_slice %3 {offsets = [0, 241], sizes = [8, 15], strides = [1, 1]} : vector<8x256xf32> to vector<8x15xf32>
    %32 = vector.extract_strided_slice %3 {offsets = [0, 0], sizes = [8, 241], strides = [1, 1]} : vector<8x256xf32> to vector<8x241xf32>
    %33 = tpu.concatenate %31, %32 in 1 : vector<8x15xf32>, vector<8x241xf32> -> vector<8x256xf32>
    %34 = arith.andi %8, %14 : vector<1x256xi1>
    %cst_10 = arith.constant 0.000000e+00 : f32
    %35 = vector.shape_cast %34 : vector<1x256xi1> to vector<1x256xi1>
    %36 = vector.broadcast %35 : vector<1x256xi1> to vector<8x256xi1>
    %37 = vector.broadcast %cst_10 : f32 to vector<8x256xf32>
    %38 = arith.select %36, %33, %37 : vector<8x256xi1>, vector<8x256xf32>
    %39 = vector.extract_strided_slice %3 {offsets = [0, 255], sizes = [8, 1], strides = [1, 1]} : vector<8x256xf32> to vector<8x1xf32>
    %40 = vector.extract_strided_slice %3 {offsets = [0, 0], sizes = [8, 255], strides = [1, 1]} : vector<8x256xf32> to vector<8x255xf32>
    %41 = tpu.concatenate %39, %40 in 1 : vector<8x1xf32>, vector<8x255xf32> -> vector<8x256xf32>
    %cst_11 = arith.constant 0.000000e+00 : f32
    %42 = vector.shape_cast %12 : vector<1x256xi1> to vector<1x256xi1>
    %43 = vector.broadcast %42 : vector<1x256xi1> to vector<8x256xi1>
    %44 = vector.broadcast %cst_11 : f32 to vector<8x256xf32>
    %45 = arith.select %43, %41, %44 : vector<8x256xi1>, vector<8x256xf32>
    %46 = vector.extract_strided_slice %3 {offsets = [0, 1], sizes = [8, 255], strides = [1, 1]} : vector<8x256xf32> to vector<8x255xf32>
    %47 = vector.extract_strided_slice %3 {offsets = [0, 0], sizes = [8, 1], strides = [1, 1]} : vector<8x256xf32> to vector<8x1xf32>
    %48 = tpu.concatenate %46, %47 in 1 : vector<8x255xf32>, vector<8x1xf32> -> vector<8x256xf32>
    %cst_12 = arith.constant 0.000000e+00 : f32
    %49 = vector.shape_cast %14 : vector<1x256xi1> to vector<1x256xi1>
    %50 = vector.broadcast %49 : vector<1x256xi1> to vector<8x256xi1>
    %51 = vector.broadcast %cst_12 : f32 to vector<8x256xf32>
    %52 = arith.select %50, %48, %51 : vector<8x256xi1>, vector<8x256xf32>
    %53 = vector.extract_strided_slice %3 {offsets = [0, 15], sizes = [8, 241], strides = [1, 1]} : vector<8x256xf32> to vector<8x241xf32>
    %54 = vector.extract_strided_slice %3 {offsets = [0, 0], sizes = [8, 15], strides = [1, 1]} : vector<8x256xf32> to vector<8x15xf32>
    %55 = tpu.concatenate %53, %54 in 1 : vector<8x241xf32>, vector<8x15xf32> -> vector<8x256xf32>
    %56 = arith.andi %10, %12 : vector<1x256xi1>
    %cst_13 = arith.constant 0.000000e+00 : f32
    %57 = vector.shape_cast %56 : vector<1x256xi1> to vector<1x256xi1>
    %58 = vector.broadcast %57 : vector<1x256xi1> to vector<8x256xi1>
    %59 = vector.broadcast %cst_13 : f32 to vector<8x256xf32>
    %60 = arith.select %58, %55, %59 : vector<8x256xi1>, vector<8x256xf32>
    %61 = vector.extract_strided_slice %3 {offsets = [0, 16], sizes = [8, 240], strides = [1, 1]} : vector<8x256xf32> to vector<8x240xf32>
    %62 = vector.extract_strided_slice %3 {offsets = [0, 0], sizes = [8, 16], strides = [1, 1]} : vector<8x256xf32> to vector<8x16xf32>
    %63 = tpu.concatenate %61, %62 in 1 : vector<8x240xf32>, vector<8x16xf32> -> vector<8x256xf32>
    %cst_14 = arith.constant 0.000000e+00 : f32
    %64 = vector.shape_cast %10 : vector<1x256xi1> to vector<1x256xi1>
    %65 = vector.broadcast %64 : vector<1x256xi1> to vector<8x256xi1>
    %66 = vector.broadcast %cst_14 : f32 to vector<8x256xf32>
    %67 = arith.select %65, %63, %66 : vector<8x256xi1>, vector<8x256xf32>
    %68 = vector.extract_strided_slice %3 {offsets = [0, 17], sizes = [8, 239], strides = [1, 1]} : vector<8x256xf32> to vector<8x239xf32>
    %69 = vector.extract_strided_slice %3 {offsets = [0, 0], sizes = [8, 17], strides = [1, 1]} : vector<8x256xf32> to vector<8x17xf32>
    %70 = tpu.concatenate %68, %69 in 1 : vector<8x239xf32>, vector<8x17xf32> -> vector<8x256xf32>
    %71 = arith.andi %10, %14 : vector<1x256xi1>
    %cst_15 = arith.constant 0.000000e+00 : f32
    %72 = vector.shape_cast %71 : vector<1x256xi1> to vector<1x256xi1>
    %73 = vector.broadcast %72 : vector<1x256xi1> to vector<8x256xi1>
    %74 = vector.broadcast %cst_15 : f32 to vector<8x256xf32>
    %75 = arith.select %73, %70, %74 : vector<8x256xi1>, vector<8x256xf32>
    %76 = tpu.concatenate %23, %30, %38, %45, %3, %52, %60, %67, %75 in 0 : vector<8x256xf32>, vector<8x256xf32>, vector<8x256xf32>, vector<8x256xf32>, vector<8x256xf32>, vector<8x256xf32>, vector<8x256xf32>, vector<8x256xf32>, vector<8x256xf32> -> vector<72x256xf32>
    %cst_16 = arith.constant dense<0.000000e+00> : vector<16x256xf32>
    %77 = tpu.matmul %15, %76, %cst_16 {dimension_numbers = #tpu.dot_dimension_numbers<[1], [0], [0], [1], [0, 0, 1, 1], [], []>} : vector<16x72xf32>, vector<72x256xf32>, vector<16x256xf32> -> vector<16x256xf32>
    %c0_17 = arith.constant 0 : index
    %c0_18 = arith.constant 0 : index
    %78 = vector.load %arg4[%c0_17, %c0_18] : memref<16x1xf32, #tpu.memory_space<vmem>>, vector<16x1xf32>
    %79 = vector.broadcast %78 : vector<16x1xf32> to vector<16x256xf32>
    %80 = arith.addf %77, %79 : vector<16x256xf32>
    %81 = vector.extract_strided_slice %80 {offsets = [0, 0], sizes = [8, 256], strides = [1, 1]} : vector<16x256xf32> to vector<8x256xf32>
    %cst_19 = arith.constant 0.000000e+00 : f32
    %82 = vector.broadcast %cst_19 : f32 to vector<8x256xf32>
    %83 = arith.cmpf oge, %81, %82 : vector<8x256xf32>
    %cst_20 = arith.constant 0.00999999977 : f32
    %84 = vector.broadcast %cst_20 : f32 to vector<8x256xf32>
    %85 = arith.mulf %84, %81 : vector<8x256xf32>
    %86 = arith.select %83, %81, %85 : vector<8x256xi1>, vector<8x256xf32>
    %87 = vector.extract_strided_slice %80 {offsets = [8, 0], sizes = [8, 256], strides = [1, 1]} : vector<16x256xf32> to vector<8x256xf32>
    %c0_21 = arith.constant 0 : index
    %c0_22 = arith.constant 0 : index
    %88 = vector.load %arg5[%c0_21, %c0_22] : memref<8x72xf32, #tpu.memory_space<vmem>>, vector<8x72xf32>
    %89 = vector.extract_strided_slice %86 {offsets = [0, 239], sizes = [8, 17], strides = [1, 1]} : vector<8x256xf32> to vector<8x17xf32>
    %90 = vector.extract_strided_slice %86 {offsets = [0, 0], sizes = [8, 239], strides = [1, 1]} : vector<8x256xf32> to vector<8x239xf32>
    %91 = tpu.concatenate %89, %90 in 1 : vector<8x17xf32>, vector<8x239xf32> -> vector<8x256xf32>
    %92 = arith.andi %8, %12 : vector<1x256xi1>
    %cst_23 = arith.constant 0.000000e+00 : f32
    %93 = vector.shape_cast %92 : vector<1x256xi1> to vector<1x256xi1>
    %94 = vector.broadcast %93 : vector<1x256xi1> to vector<8x256xi1>
    %95 = vector.broadcast %cst_23 : f32 to vector<8x256xf32>
    %96 = arith.select %94, %91, %95 : vector<8x256xi1>, vector<8x256xf32>
    %97 = vector.extract_strided_slice %86 {offsets = [0, 240], sizes = [8, 16], strides = [1, 1]} : vector<8x256xf32> to vector<8x16xf32>
    %98 = vector.extract_strided_slice %86 {offsets = [0, 0], sizes = [8, 240], strides = [1, 1]} : vector<8x256xf32> to vector<8x240xf32>
    %99 = tpu.concatenate %97, %98 in 1 : vector<8x16xf32>, vector<8x240xf32> -> vector<8x256xf32>
    %cst_24 = arith.constant 0.000000e+00 : f32
    %100 = vector.shape_cast %8 : vector<1x256xi1> to vector<1x256xi1>
    %101 = vector.broadcast %100 : vector<1x256xi1> to vector<8x256xi1>
    %102 = vector.broadcast %cst_24 : f32 to vector<8x256xf32>
    %103 = arith.select %101, %99, %102 : vector<8x256xi1>, vector<8x256xf32>
    %104 = vector.extract_strided_slice %86 {offsets = [0, 241], sizes = [8, 15], strides = [1, 1]} : vector<8x256xf32> to vector<8x15xf32>
    %105 = vector.extract_strided_slice %86 {offsets = [0, 0], sizes = [8, 241], strides = [1, 1]} : vector<8x256xf32> to vector<8x241xf32>
    %106 = tpu.concatenate %104, %105 in 1 : vector<8x15xf32>, vector<8x241xf32> -> vector<8x256xf32>
    %107 = arith.andi %8, %14 : vector<1x256xi1>
    %cst_25 = arith.constant 0.000000e+00 : f32
    %108 = vector.shape_cast %107 : vector<1x256xi1> to vector<1x256xi1>
    %109 = vector.broadcast %108 : vector<1x256xi1> to vector<8x256xi1>
    %110 = vector.broadcast %cst_25 : f32 to vector<8x256xf32>
    %111 = arith.select %109, %106, %110 : vector<8x256xi1>, vector<8x256xf32>
    %112 = vector.extract_strided_slice %86 {offsets = [0, 255], sizes = [8, 1], strides = [1, 1]} : vector<8x256xf32> to vector<8x1xf32>
    %113 = vector.extract_strided_slice %86 {offsets = [0, 0], sizes = [8, 255], strides = [1, 1]} : vector<8x256xf32> to vector<8x255xf32>
    %114 = tpu.concatenate %112, %113 in 1 : vector<8x1xf32>, vector<8x255xf32> -> vector<8x256xf32>
    %cst_26 = arith.constant 0.000000e+00 : f32
    %115 = vector.shape_cast %12 : vector<1x256xi1> to vector<1x256xi1>
    %116 = vector.broadcast %115 : vector<1x256xi1> to vector<8x256xi1>
    %117 = vector.broadcast %cst_26 : f32 to vector<8x256xf32>
    %118 = arith.select %116, %114, %117 : vector<8x256xi1>, vector<8x256xf32>
    %119 = vector.extract_strided_slice %86 {offsets = [0, 1], sizes = [8, 255], strides = [1, 1]} : vector<8x256xf32> to vector<8x255xf32>
    %120 = vector.extract_strided_slice %86 {offsets = [0, 0], sizes = [8, 1], strides = [1, 1]} : vector<8x256xf32> to vector<8x1xf32>
    %121 = tpu.concatenate %119, %120 in 1 : vector<8x255xf32>, vector<8x1xf32> -> vector<8x256xf32>
    %cst_27 = arith.constant 0.000000e+00 : f32
    %122 = vector.shape_cast %14 : vector<1x256xi1> to vector<1x256xi1>
    %123 = vector.broadcast %122 : vector<1x256xi1> to vector<8x256xi1>
    %124 = vector.broadcast %cst_27 : f32 to vector<8x256xf32>
    %125 = arith.select %123, %121, %124 : vector<8x256xi1>, vector<8x256xf32>
    %126 = vector.extract_strided_slice %86 {offsets = [0, 15], sizes = [8, 241], strides = [1, 1]} : vector<8x256xf32> to vector<8x241xf32>
    %127 = vector.extract_strided_slice %86 {offsets = [0, 0], sizes = [8, 15], strides = [1, 1]} : vector<8x256xf32> to vector<8x15xf32>
    %128 = tpu.concatenate %126, %127 in 1 : vector<8x241xf32>, vector<8x15xf32> -> vector<8x256xf32>
    %129 = arith.andi %10, %12 : vector<1x256xi1>
    %cst_28 = arith.constant 0.000000e+00 : f32
    %130 = vector.shape_cast %129 : vector<1x256xi1> to vector<1x256xi1>
    %131 = vector.broadcast %130 : vector<1x256xi1> to vector<8x256xi1>
    %132 = vector.broadcast %cst_28 : f32 to vector<8x256xf32>
    %133 = arith.select %131, %128, %132 : vector<8x256xi1>, vector<8x256xf32>
    %134 = vector.extract_strided_slice %86 {offsets = [0, 16], sizes = [8, 240], strides = [1, 1]} : vector<8x256xf32> to vector<8x240xf32>
    %135 = vector.extract_strided_slice %86 {offsets = [0, 0], sizes = [8, 16], strides = [1, 1]} : vector<8x256xf32> to vector<8x16xf32>
    %136 = tpu.concatenate %134, %135 in 1 : vector<8x240xf32>, vector<8x16xf32> -> vector<8x256xf32>
    %cst_29 = arith.constant 0.000000e+00 : f32
    %137 = vector.shape_cast %10 : vector<1x256xi1> to vector<1x256xi1>
    %138 = vector.broadcast %137 : vector<1x256xi1> to vector<8x256xi1>
    %139 = vector.broadcast %cst_29 : f32 to vector<8x256xf32>
    %140 = arith.select %138, %136, %139 : vector<8x256xi1>, vector<8x256xf32>
    %141 = vector.extract_strided_slice %86 {offsets = [0, 17], sizes = [8, 239], strides = [1, 1]} : vector<8x256xf32> to vector<8x239xf32>
    %142 = vector.extract_strided_slice %86 {offsets = [0, 0], sizes = [8, 17], strides = [1, 1]} : vector<8x256xf32> to vector<8x17xf32>
    %143 = tpu.concatenate %141, %142 in 1 : vector<8x239xf32>, vector<8x17xf32> -> vector<8x256xf32>
    %144 = arith.andi %10, %14 : vector<1x256xi1>
    %cst_30 = arith.constant 0.000000e+00 : f32
    %145 = vector.shape_cast %144 : vector<1x256xi1> to vector<1x256xi1>
    %146 = vector.broadcast %145 : vector<1x256xi1> to vector<8x256xi1>
    %147 = vector.broadcast %cst_30 : f32 to vector<8x256xf32>
    %148 = arith.select %146, %143, %147 : vector<8x256xi1>, vector<8x256xf32>
    %149 = tpu.concatenate %96, %103, %111, %118, %86, %125, %133, %140, %148 in 0 : vector<8x256xf32>, vector<8x256xf32>, vector<8x256xf32>, vector<8x256xf32>, vector<8x256xf32>, vector<8x256xf32>, vector<8x256xf32>, vector<8x256xf32>, vector<8x256xf32> -> vector<72x256xf32>
    %cst_31 = arith.constant dense<0.000000e+00> : vector<8x256xf32>
    %150 = tpu.matmul %88, %149, %cst_31 {dimension_numbers = #tpu.dot_dimension_numbers<[1], [0], [0], [1], [0, 0, 1, 1], [], []>} : vector<8x72xf32>, vector<72x256xf32>, vector<8x256xf32> -> vector<8x256xf32>
    %c0_32 = arith.constant 0 : index
    %c0_33 = arith.constant 0 : index
    %151 = vector.load %arg6[%c0_32, %c0_33] : memref<8x1xf32, #tpu.memory_space<vmem>>, vector<8x1xf32>
    %152 = vector.broadcast %151 : vector<8x1xf32> to vector<8x256xf32>
    %153 = arith.addf %150, %152 : vector<8x256xf32>
    %154 = arith.addf %153, %87 : vector<8x256xf32>
    %cst_34 = arith.constant 0.000000e+00 : f32
    %155 = vector.broadcast %cst_34 : f32 to vector<8x256xf32>
    %156 = arith.cmpf oge, %154, %155 : vector<8x256xf32>
    %cst_35 = arith.constant 0.00999999977 : f32
    %157 = vector.broadcast %cst_35 : f32 to vector<8x256xf32>
    %158 = arith.mulf %157, %154 : vector<8x256xf32>
    %159 = arith.select %156, %154, %158 : vector<8x256xi1>, vector<8x256xf32>
    %160 = vector.extract_strided_slice %159 {offsets = [0, 0], sizes = [6, 256], strides = [1, 1]} : vector<8x256xf32> to vector<6x256xf32>
    %c0_36 = arith.constant 0 : index
    %c0_37 = arith.constant 0 : index
    %c0_38 = arith.constant 0 : index
    %161 = vector.load %arg7[%c0_36, %c0_37, %c0_38] : memref<1x6x256xf32, #tpu.memory_space<vmem>>, vector<1x6x256xf32>
    %162 = vector.shape_cast %161 : vector<1x6x256xf32> to vector<6x256xf32>
    %163 = vector.shape_cast %160 : vector<6x256xf32> to vector<1x6x256xf32>
    tpu.vector_store %arg7[%c0_36, %c0_37, %c0_38], %163 {strides = array<i32>} : memref<1x6x256xf32, #tpu.memory_space<vmem>>, vector<1x6x256xf32>,
    return
  }
  func.func @transform_0(%arg0: i32) -> (i32, i32, i32) {
    %c0_i32 = arith.constant 0 : i32
    %c0_i32_0 = arith.constant 0 : i32
    %c0_i32_1 = arith.constant 0 : i32
    return %arg0, %c0_i32, %c0_i32_0 : i32, i32, i32
  }
  func.func @transform_1(%arg0: i32) -> (i32, i32) {
    %c0_i32 = arith.constant 0 : i32
    %c0_i32_0 = arith.constant 0 : i32
    %c0_i32_1 = arith.constant 0 : i32
    return %c0_i32, %c0_i32_0 : i32, i32
  }
  func.func @transform_2(%arg0: i32) -> (i32, i32) {
    %c0_i32 = arith.constant 0 : i32
    %c0_i32_0 = arith.constant 0 : i32
    %c0_i32_1 = arith.constant 0 : i32
    return %c0_i32, %c0_i32_0 : i32, i32
  }
  func.func @transform_3(%arg0: i32) -> (i32, i32) {
    %c0_i32 = arith.constant 0 : i32
    %c0_i32_0 = arith.constant 0 : i32
    %c0_i32_1 = arith.constant 0 : i32
    return %c0_i32, %c0_i32_0 : i32, i32
  }
  func.func @transform_4(%arg0: i32) -> (i32, i32) {
    %c0_i32 = arith.constant 0 : i32
    %c0_i32_0 = arith.constant 0 : i32
    %c0_i32_1 = arith.constant 0 : i32
    return %c0_i32, %c0_i32_0 : i32, i32
  }
  func.func @transform_5(%arg0: i32) -> (i32, i32) {
    %c0_i32 = arith.constant 0 : i32
    %c0_i32_0 = arith.constant 0 : i32
    %c0_i32_1 = arith.constant 0 : i32
    return %c0_i32, %c0_i32_0 : i32, i32
  }
  func.func @transform_6(%arg0: i32) -> (i32, i32, i32) {
    %c0_i32 = arith.constant 0 : i32
    %c0_i32_0 = arith.constant 0 : i32
    %c0_i32_1 = arith.constant 0 : i32
    return %arg0, %c0_i32, %c0_i32_0 : i32, i32, i32
  }
}

</mosaic_0001>

<bundles_post_ra>
// kernel: resnet_block.1
= control target key start
LH: loop header
LB: loop body
LE: loop exit
PB: predicated region body
PF: predicated region fallthrough
CT: control target
= control target key end

     0   :  { %s831_s21 = smov 0   ;;  %s1108_s0 = inlined_call_operand.vmem [shape: f32[2,4,256], index: 0, kind: input, shape index: {}]   ;;  %s1109_s1 = inlined_call_operand.vmem [shape: s32[2,256], index: 1, kind: input, shape index: {}]   ;;  %s1110_s2 = inlined_call_operand.vmem [shape: f32[16,72], index: 2, kind: input, shape index: {}]   ;;  %s1111_s3 = inlined_call_operand.vmem [shape: f32[16,1], index: 3, kind: input, shape index: {}]   ;;  %s1112_s4 = inlined_call_operand.vmem [shape: f32[8,72], index: 4, kind: input, shape index: {}]   ;;  %s1113_s5 = inlined_call_operand.vmem [shape: f32[8,1], index: 5, kind: input, shape index: {}]   ;;  %s1114_s6 = inlined_call_operand.vmem [shape: f32[2,6,256], index: 6, kind: output, shape index: {}]  }
   0x1 LB: > { %s705_s22 = sadd.s32 4294967295, %s785_s21   ;;  %p709_p0 = scmp.ge.s32.totalorder %s785_s21, 1  ;;  %s785_s21 = sphi %s831_s21, %s16_s21  }
   0x2   : > { %p212_p1 = scmp.lt.s32.totalorder %s785_s21, 3 }
   0x4   : > { %p213_p2 = pnand %p709_p0, %p212_p1 }
   0x5   : > { %p242_p3 = scmp.lt.s32.totalorder (!%p213_p2), %s705_s22, 1  ;;  %s787_s27 = smov (!%p213_p2), 112  }
   0x6   : > { %216 = sbr.rel (%p213_p2) target bundleno = 605 (0x25d), region = 44  ;;  %s788_s28 = smov (!%p213_p2), 111  }
   0x7   : > { %s789_s29 = smov (!%p213_p2), 113   ;;  %s790_s30 = smov (!%p213_p2), 127  }
   0x8   : > { %s791_s7 = smov (!%p213_p2), 1   ;;  %s792_s8 = smov (!%p213_p2), 15  }
   0x9   : > { %s793_s9 = smov (!%p213_p2), 16   ;;  %s794_s10 = smov (!%p213_p2), 17  }
   0xb   : > { %s1145_s22 = smov (!%p242_p3, %s705_s22), 1  ;;  %vm259_vm0 = vcmask 1043456   ;;  %v795_v5 = vmov 0   ;;  %v874_v6 = vld [vmem:[%s1109_s1] sm:$0xf]  ;;  %vm413_vm7 = vcmask 908288  }
   0xc   : > { %s758_s23 = sshll.u32 %s1145_s22, 3  ;;  %777 = vset.pattern.permute.xlu1 %v795_v5  ;;  %778 = vset.pattern.permute.xlu0 %v795_v5  ;;  %vm264_vm1 = vcmp.lt.s32.totalorder %v874_v6, 15  ;;  %vm263_vm2 = vcmp.ge.s32.totalorder %v874_v6, 1  ;;  %vm395_vm10 = vcmask 916480   ;;  %vm375_vm13 = vcmask 924672   ;;  %v429_v41 = vld [vmem:[%s1111_s3] sm:$0xff] }
   0xd   : > { %s246_s26 = scalar_lea.vmem %s1108_s0, %s758_s23  ;;  %v321_v7 = vsel %vm264_vm1, 1, %v795_v5  ;;  %v882_v8 = vsel %vm263_vm2, 1, %v795_v5 }
   0xe   : > { %v252_v0 = vld [vmem:[%s246_s26] sm:$0xff]  ;;  %v715_v9 = vrot.slane %v321_v7, 9  ;;  %v714_v10 = vrot.slane %v882_v8, 9  ;;  %v401_v20 = vperm.slane %v321_v7, 0  ;;  %v402_v21 = vperm.slane %v321_v7, 2 }
   0xf   : > { %254 = vst [vmem:[#allocation1] ss:$2 sm:$0xff] %v252_v0  ;;  %v363_v31 = vperm.slane %v321_v7, 1  ;;  %v364_v32 = vperm.slane %v321_v7, 3  ;;  %v345_v46 = vperm.slane %v882_v8, 1  ;;  %v346_v47 = vperm.slane %v882_v8, 3 }
  0x10   : > { %vm885_vm3 = vcmp.ne.s32.totalorder %v715_v9, 0  ;;  %vm891_vm5 = vcmp.ne.s32.totalorder %v714_v10, 0  ;;  %v903_v27 = vperm.slane %v401_v20, 0  ;;  %v905_v28 = vperm.slane %v402_v21, 0 }
  0x11   : > { %vm419_vm4 = vmand %vm264_vm1, %vm885_vm3  ;;  %v929_v39 = vperm.slane %v363_v31, 1  ;;  %v931_v40 = vperm.slane %v364_v32, 1  ;;  %v957_v54 = vperm.slane %v345_v46, 1  ;;  %v959_v55 = vperm.slane %v346_v47, 1 }
  0x12   : > { %v420_v14 = vsel %vm419_vm4, 1, %v795_v5  ;;  %vm381_vm6 = vmand %vm264_vm1, %vm891_vm5  ;;  %vm405_vm11 = vcmp.eq.s32.totalorder %v903_v27, 1  ;;  %vm406_vm12 = vcmp.eq.s32.totalorder %v905_v28, 1  ;;  %v303_v59 = vperm.slane %v882_v8, 0 }
  0x13   : > { %v421_v15 = vperm.slane %v420_v14, 0  ;;  %v422_v16 = vperm.slane %v420_v14, 2  ;;  %v382_v17 = vsel %vm381_vm6, 1, %v795_v5  ;;  %vm325_vm1 = vmand %vm263_vm2, %vm885_vm3  ;;  %vm1116_vm3 = vcmask 1039360  }
  0x14   : > { %v383_v22 = vperm.slane %v382_v17, 0  ;;  %v384_v23 = vperm.slane %v382_v17, 2  ;;  %v326_v45 = vsel %vm325_vm1, 1, %v795_v5  ;;  %vm1115_vm4 = vcmp.eq.s32.totalorder %v929_v39, 1 }
  0x15   : > { %v899_v24 = vperm.slane %v421_v15, 0  ;;  %v901_v25 = vperm.slane %v422_v16, 0  ;;  %vm1117_vm6 = vcmp.eq.s32.totalorder %v931_v40, 1  ;;  %v327_v50 = vperm.slane %v326_v45, 0  ;;  %v265_v16 = vld [vmem:[%s1110_s2] sm:$0xff] }
  0x16   : > { %v845_v1 = vld.sshfl [vmem:[#allocation1] sm:$0xff pattern:$0x75316420]  ;;  %v852_v3 = vld.sshfl [vmem:[#allocation1 + $0x8] sm:$0xff pattern:$0x75316420] }
  0x17   : > { %v260_v2 = vsel %vm259_vm0, %v845_v1, 0.0  ;;  %v261_v4 = vsel %vm259_vm0, %v852_v3, 0.0  ;;  %v907_v29 = vperm.slane %v383_v22, 0  ;;  %v909_v30 = vperm.slane %v384_v23, 0 }
  0x18   : > { %391 = vrot.lane.b32.xlu1 %v260_v2, %s787_s27  ;;  %409 = vrot.lane.b32.xlu0 %v260_v2, %s788_s28  ;;  %vm425_vm8 = vcmp.eq.s32.totalorder %v899_v24, 1  ;;  %vm426_vm9 = vcmp.eq.s32.totalorder %v901_v25, 1  ;;  %v328_v51 = vperm.slane %v326_v45, 2  ;;  %v965_v56 = vperm.slane %v327_v50, 0  ;;  %v266_v24 = vld [vmem:[%s1110_s2 + $0x8] sm:$0xff] }
  0x19   : > { %371 = vrot.lane.b32.xlu2 %v260_v2, %s789_s29  ;;  %vm1119_vm14 = vcmp.eq.s32.totalorder %v907_v29, 1  ;;  %vm1118_vm15 = vcmp.eq.s32.totalorder %v909_v30, 1  ;;  %vm340_vm1 = vcmask 7168   ;;  %v304_v60 = vperm.slane %v882_v8, 2  ;;  %v430_v25 = vld [vmem:[%s1111_s3 + $0x8] sm:$0xff] }
  0x1a   : > { %v967_v57 = vperm.slane %v328_v51, 0 }
  0x20   : > { %393 = vrot.lane.b32.xlu1 %v261_v4, %s787_s27  ;;  %411 = vrot.lane.b32.xlu0 %v261_v4, %s788_s28 }
  0x21   : > { %373 = vrot.lane.b32.xlu2 %v261_v4, %s789_s29 }
  0x28   : > { %355 = vrot.lane.b32.xlu1 %v261_v4, %s790_s30  ;;  %353 = vrot.lane.b32.xlu0 %v260_v2, %s790_s30 }
  0x29   : > { %335 = vrot.lane.b32.xlu2 %v261_v4, %s791_s7 }
  0x30   : > { %311 = vrot.lane.b32.xlu1 %v261_v4, %s792_s8  ;;  %338 = vrot.lane.b32.xlu0 %v260_v2, %s791_s7 }
  0x31   : > { %314 = vrot.lane.b32.xlu2 %v260_v2, %s792_s8 }
  0x38   : > { %296 = vrot.lane.b32.xlu1 %v260_v2, %s793_s9  ;;  %293 = vrot.lane.b32.xlu0 %v261_v4, %s793_s9 }
  0x39   : > { %268 = vrot.lane.b32.xlu2 %v261_v4, %s794_s10  ;;  %v989_v4 = vperm.slane %v304_v60, 0 }
  0x40   : > { %272 = vrot.lane.b32.xlu0 %v260_v2, %s794_s10  ;;  %433 = vperm.xlu1 %777, %v429_v41  }
  0x73   : > { %v372_v13 = vpop.permute.xlu2 %371 }
  0x7b   : > { %v374_v26 = vpop.permute.xlu2 %373 }
  0x7c   : > { %v376_v43 = vsel %vm375_vm13, %v372_v13, %v374_v26  ;;  %v380_v44 = vsel %vm375_vm13, %v374_v26, %v372_v13 }
  0x83   : > { %v336_v42 = vpop.permute.xlu2 %335 }
  0x8a   : > { %v392_v18 = vpop.permute.xlu1 %391  ;;  %v410_v19 = vpop.permute.xlu0 %409 }
  0x8b   : > { %v315_v58 = vpop.permute.xlu2 %314 }
  0x92   : > { %v394_v33 = vpop.permute.xlu1 %393  ;;  %v412_v34 = vpop.permute.xlu0 %411 }
  0x93   : > { %v414_v35 = vsel %vm413_vm7, %v410_v19, %v412_v34  ;;  %v418_v36 = vsel %vm413_vm7, %v412_v34, %v410_v19  ;;  %v396_v37 = vsel %vm395_vm10, %v392_v18, %v394_v33  ;;  %v400_v38 = vsel %vm395_vm10, %v394_v33, %v392_v18  ;;  %v269_v14 = vpop.permute.xlu2 %268  ;;  %v591_v34 = vld [vmem:[%s1113_s5] sm:$0xff] }
  0x94   : > { %716 = vmatpush.msk.msra.mxu0 %vm425_vm8, %v414_v35  ;;  %727 = vmatpush.msk.msra.mxu1 %vm426_vm9, %v418_v36 }
  0x96   : > { %717 = vmatpush.msk.msra.mxu0 %vm405_vm11, %v396_v37  ;;  %728 = vmatpush.msk.msra.mxu1 %vm406_vm12, %v400_v38 }
  0x98   : > { %718 = vmatpush.msk.msra.mxu0 %vm1119_vm14, %v376_v43  ;;  %729 = vmatpush.msk.msra.mxu1 %vm1118_vm15, %v380_v44  ;;  %vm1122_vm15 = vcmp.eq.s32.totalorder %v965_v56, 1  ;;  %vm283_vm14 = vmand %vm263_vm2, %vm891_vm5  ;;  %vm1124_vm5 = vcmp.eq.s32.totalorder %v989_v4, 1 }
  0x99   : > { %v284_v7 = vsel %vm283_vm14, 1, %v795_v5  ;;  %vm274_vm14 = vcmask 138240  }
  0x9a   : > { %v356_v48 = vpop.permute.xlu1 %355  ;;  %v354_v49 = vpop.permute.xlu0 %353  ;;  %v285_v6 = vperm.slane %v284_v7, 0  ;;  %v286_v8 = vperm.slane %v284_v7, 2 }
  0x9b   : > { %v358_v52 = vsel %vm1116_vm3, %v354_v49, %v356_v48  ;;  %v362_v53 = vsel %vm1116_vm3, %v356_v48, %v354_v49  ;;  %vm349_vm3 = vcmp.eq.s32.totalorder %v957_v54, 1 }
  0x9c   : > { %719 = vmatpush.msk.msra.mxu0 %vm1115_vm4, %v358_v52  ;;  %730 = vmatpush.msk.msra.mxu1 %vm1117_vm6, %v362_v53  ;;  %vm1120_vm4 = vcmask 121856   ;;  %vm350_vm6 = vcmp.eq.s32.totalorder %v959_v55, 1  ;;  %v1004_v5 = vperm.slane %v285_v6, 0  ;;  %v1006_v13 = vperm.slane %v286_v8, 0 }
  0x9e   : > { %720 = vmatpush.msk.msra.mxu0 %vm259_vm0, %v845_v1  ;;  %731 = vmatpush.msk.msra.mxu1 %vm259_vm0, %v852_v3  ;;  %vm1121_vm0 = vcmp.eq.s32.totalorder %v967_v57, 1  ;;  %v987_v3 = vperm.slane %v303_v59, 0 }
  0xa0   : > { %vm1125_vm2 = vcmp.eq.s32.totalorder %v987_v3, 1 }
  0xa2   : > { %v312_v61 = vpop.permute.xlu1 %311  ;;  %v339_v62 = vpop.permute.xlu0 %338 }
  0xa3   : > { %v344_v63 = vsel %vm340_vm1, %v336_v42, %v339_v62  ;;  %v341_v0 = vsel %vm340_vm1, %v339_v62, %v336_v42  ;;  %v320_v1 = vsel %vm1120_vm4, %v312_v61, %v315_v58  ;;  %v317_v2 = vsel %vm1120_vm4, %v315_v58, %v312_v61 }
  0xa4   : > { %721 = vmatpush.msk.msra.mxu0 %vm349_vm3, %v344_v63  ;;  %732 = vmatpush.msk.msra.mxu1 %vm350_vm6, %v341_v0  ;;  %vm1123_vm4 = vcmask 130048  }
  0xa6   : > { %722 = vmatpush.msk.msra.mxu0 %vm1122_vm15, %v320_v1  ;;  %733 = vmatpush.msk.msra.mxu1 %vm1121_vm0, %v317_v2  ;;  %vm289_vm0 = vcmp.eq.s32.totalorder %v1004_v5, 1  ;;  %vm290_vm15 = vcmp.eq.s32.totalorder %v1006_v13, 1 }
  0xaa   : > { %v297_v9 = vpop.permute.xlu1 %296  ;;  %v294_v10 = vpop.permute.xlu0 %293 }
  0xab   : > { %v302_v11 = vsel %vm1123_vm4, %v294_v10, %v297_v9  ;;  %v299_v12 = vsel %vm1123_vm4, %v297_v9, %v294_v10  ;;  %vm441_vm4 = vcmask 588800  }
  0xac   : > { %723 = vmatpush.msk.msra.mxu0 %vm1125_vm2, %v302_v11  ;;  %734 = vmatpush.msk.msra.mxu1 %vm1124_vm5, %v299_v12 }
  0xb2   : > { %v273_v15 = vpop.permute.xlu0 %272  ;;  %v434_v19 = vpop.permute.xlu1 %433 }
  0xb3   : > { %v278_v17 = vsel %vm274_vm14, %v269_v14, %v273_v15  ;;  %v275_v18 = vsel %vm274_vm14, %v273_v15, %v269_v14 }
  0xb4   : > { %724 = vmatpush.msk.msra.mxu0 %vm289_vm0, %v278_v17  ;;  %735 = vmatpush.msk.msra.mxu1 %vm290_vm15, %v275_v18 }
  0xb5   : > { %725 = vmatmul.msk.f32.vlgmr.msra.gmra.mxu0 %vm441_vm4, %v265_v16  ;;  %736 = vmatmul.msk.f32.vlgmr.msra.gmra.mxu1 %vm441_vm4, %v265_v16 }
  0xbd   : > { %726 = vmatmul.msk.f32.gmra.mxu0 %vm441_vm4, %v266_v24  ;;  %737 = vmatmul.msk.f32.gmra.mxu1 %vm441_vm4, %v266_v24 }
 0x132   : > { %v465_v20 = vpop.f32.mrf.mxu0  ;;  %v488_v21 = vpop.f32.mrf.mxu1 }
 0x133   : > { %v466_v22 = vadd.f32 %v465_v20, %v434_v19  ;;  %v489_v23 = vadd.f32 %v488_v21, %v434_v19 }
 0x135   : > { %vm494_vm5 = vcmp.ge.f32.partialorder %v466_v22, 0.0  ;;  %v496_v26 = vmul.f32 0.01, %v466_v22  ;;  %vm495_vm2 = vcmp.ge.f32.partialorder %v489_v23, 0.0  ;;  %v497_v31 = vmul.f32 0.01, %v489_v23 }
 0x137   : > { %v498_v32 = vsel %vm494_vm5, %v466_v22, %v496_v26  ;;  %v499_v33 = vsel %vm495_vm2, %v489_v23, %v497_v31  ;;  %vm1138_vm5 = vcmp.eq.s32.totalorder %v965_v56, 1  ;;  %v500_v56 = vld [vmem:[%s1112_s4] sm:$0xff] }
 0x138   : > { %569 = vrot.lane.b32.xlu1 %v498_v32, %s787_s27  ;;  %580 = vrot.lane.b32.xlu2 %v498_v32, %s788_s28 }
 0x139   : > { %582 = vrot.lane.b32.xlu0 %v499_v33, %s788_s28 }
 0x13a   : > { %v468_v0 = vpop.f32.mrf.mxu0  ;;  %v491_v1 = vpop.f32.mrf.mxu1 }
 0x140   : > { %560 = vrot.lane.b32.xlu1 %v499_v33, %s789_s29  ;;  %571 = vrot.lane.b32.xlu2 %v499_v33, %s787_s27  ;;  %s759_s27 = sshll.u32 %s1145_s22, 4 }
 0x141   : > { %558 = vrot.lane.b32.xlu0 %v498_v32, %s789_s29 }
 0x148   : > { %536 = vrot.lane.b32.xlu1 %v499_v33, %s791_s7  ;;  %547 = vrot.lane.b32.xlu2 %v498_v32, %s790_s30 }
 0x149   : > { %549 = vrot.lane.b32.xlu0 %v499_v33, %s790_s30  ;;  %s251_s30 = scalar_lea.vmem %s1114_s6, %s759_s27 }
 0x150   : > { %528 = vrot.lane.b32.xlu1 %v498_v32, %s792_s8  ;;  %539 = vrot.lane.b32.xlu2 %v498_v32, %s791_s7 }
 0x151   : > { %525 = vrot.lane.b32.xlu0 %v499_v33, %s792_s8 }
 0x158   : > { %502 = vrot.lane.b32.xlu1 %v499_v33, %s794_s10  ;;  %514 = vrot.lane.b32.xlu2 %v499_v33, %s793_s9 }
 0x159   : > { %517 = vrot.lane.b32.xlu0 %v498_v32, %s793_s9 }
 0x160   : > { %594 = vperm.xlu1 %777, %v591_v34   ;;  %506 = vrot.lane.b32.xlu2 %v498_v32, %s794_s10 }
 0x161   : > { %438 = vperm.xlu0 %778, %v430_v25  }
 0x192   : > { %v581_v35 = vpop.permute.xlu2 %580 }
 0x19a   : > { %v572_v36 = vpop.permute.xlu2 %571 }
 0x1a2   : > { %v548_v45 = vpop.permute.xlu2 %547 }
 0x1aa   : > { %v570_v37 = vpop.permute.xlu1 %569  ;;  %v540_v28 = vpop.permute.xlu2 %539 }
 0x1ab   : > { %v583_v38 = vpop.permute.xlu0 %582  ;;  %v573_v43 = vsel %vm395_vm10, %v570_v37, %v572_v36  ;;  %v577_v44 = vsel %vm395_vm10, %v572_v36, %v570_v37 }
 0x1ac   : > { %v584_v41 = vsel %vm413_vm7, %v581_v35, %v583_v38  ;;  %v588_v42 = vsel %vm413_vm7, %v583_v38, %v581_v35  ;;  %vm1130_vm7 = vcmp.eq.s32.totalorder %v907_v29, 1 }
 0x1ad   : > { %738 = vmatpush.msk.msra.mxu2 %vm425_vm8, %v584_v41  ;;  %747 = vmatpush.msk.msra.mxu3 %vm426_vm9, %v588_v42  ;;  %vm1131_vm8 = vcmp.eq.s32.totalorder %v909_v30, 1  ;;  %vm1132_vm9 = vcmask 1039360  }
 0x1ae   : > { %vm1133_vm10 = vmmov %vm1132_vm9 }
 0x1af   : > { %739 = vmatpush.msk.msra.mxu2 %vm405_vm11, %v573_v43  ;;  %748 = vmatpush.msk.msra.mxu3 %vm406_vm12, %v577_v44  ;;  %vm1134_vm11 = vcmp.eq.s32.totalorder %v929_v39, 1  ;;  %vm1135_vm12 = vcmp.eq.s32.totalorder %v931_v40, 1 }
 0x1b2   : > { %v561_v46 = vpop.permute.xlu1 %560  ;;  %v515_v58 = vpop.permute.xlu2 %514 }
 0x1b3   : > { %v559_v47 = vpop.permute.xlu0 %558 }
 0x1b4   : > { %v562_v27 = vsel %vm375_vm13, %v559_v47, %v561_v46  ;;  %v566_v48 = vsel %vm375_vm13, %v561_v46, %v559_v47  ;;  %vm1136_vm13 = vcmask 121856  }
 0x1b5   : > { %740 = vmatpush.msk.msra.mxu2 %vm1130_vm7, %v562_v27  ;;  %749 = vmatpush.msk.msra.mxu3 %vm1131_vm8, %v566_v48  ;;  %vm1137_vm2 = vmmov %vm1136_vm13  ;;  %vm1139_vm7 = vcmp.eq.s32.totalorder %v967_v57, 1  ;;  %vm1143_vm8 = vcmp.eq.s32.totalorder %v989_v4, 1 }
 0x1ba   : > { %v537_v49 = vpop.permute.xlu1 %536  ;;  %v507_v62 = vpop.permute.xlu2 %506 }
 0x1bb   : > { %v550_v50 = vpop.permute.xlu0 %549  ;;  %v544_v29 = vsel %vm340_vm1, %v537_v49, %v540_v28  ;;  %v541_v30 = vsel %vm340_vm1, %v540_v28, %v537_v49  ;;  %vm1140_vm1 = vcmask 130048  }
 0x1bc   : > { %v551_v51 = vsel %vm1132_vm9, %v548_v45, %v550_v50  ;;  %v555_v52 = vsel %vm1133_vm10, %v550_v50, %v548_v45 }
 0x1bd   : > { %741 = vmatpush.msk.msra.mxu2 %vm1134_vm11, %v551_v51  ;;  %750 = vmatpush.msk.msra.mxu3 %vm1135_vm12, %v555_v52 }
 0x1bf   : > { %611 = vmatpush.msra.mxu2 %v498_v32  ;;  %631 = vmatpush.msra.mxu3 %v499_v33 }
 0x1c1   : > { %742 = vmatpush.msk.msra.mxu2 %vm349_vm3, %v544_v29  ;;  %751 = vmatpush.msk.msra.mxu3 %vm350_vm6, %v541_v30  ;;  %vm1141_vm3 = vmmov %vm1140_vm1  ;;  %vm1142_vm6 = vcmp.eq.s32.totalorder %v987_v3, 1 }
 0x1c2   : > { %v529_v53 = vpop.permute.xlu1 %528 }
 0x1c3   : > { %v526_v59 = vpop.permute.xlu0 %525 }
 0x1c4   : > { %v533_v39 = vsel %vm1136_vm13, %v526_v59, %v529_v53  ;;  %v530_v40 = vsel %vm1137_vm2, %v529_v53, %v526_v59 }
 0x1c5   : > { %743 = vmatpush.msk.msra.mxu2 %vm1138_vm5, %v533_v39  ;;  %752 = vmatpush.msk.msra.mxu3 %vm1139_vm7, %v530_v40 }
 0x1ca   : > { %v503_v60 = vpop.permute.xlu1 %502 }
 0x1cb   : > { %v518_v61 = vpop.permute.xlu0 %517  ;;  %v511_v57 = vsel %vm274_vm14, %v503_v60, %v507_v62  ;;  %v508_v63 = vsel %vm274_vm14, %v507_v62, %v503_v60 }
 0x1cc   : > { %v522_v54 = vsel %vm1140_vm1, %v515_v58, %v518_v61  ;;  %v519_v55 = vsel %vm1141_vm3, %v518_v61, %v515_v58 }
 0x1cd   : > { %744 = vmatpush.msk.msra.mxu2 %vm1142_vm6, %v522_v54  ;;  %753 = vmatpush.msk.msra.mxu3 %vm1143_vm8, %v519_v55 }
 0x1cf   : > { %745 = vmatpush.msk.msra.mxu2 %vm289_vm0, %v511_v57  ;;  %754 = vmatpush.msk.msra.mxu3 %vm290_vm15, %v508_v63 }
 0x1d0   : > { %746 = vmatmul.msk.f32.vlgmr.msra.gmra.mxu2 %vm441_vm4, %v500_v56  ;;  %755 = vmatmul.msk.f32.vlgmr.msra.gmra.mxu3 %vm441_vm4, %v500_v56 }
 0x1d2   : > { %v595_v3 = vpop.permute.xlu1 %594 }
 0x1d3   : > { %v439_v2 = vpop.permute.xlu0 %438 }
 0x1d4   : > { %v469_v4 = vadd.f32 %v468_v0, %v439_v2  ;;  %v492_v7 = vadd.f32 %v491_v1, %v439_v2 }
 0x253   : > { %v617_v6 = vpop.f32.mrf.mxu2  ;;  %v637_v8 = vpop.f32.mrf.mxu3 }
 0x254   : > { %v618_v9 = vadd.f32 %v617_v6, %v595_v3  ;;  %v638_v10 = vadd.f32 %v637_v8, %v595_v3 }
 0x256   : > { %v640_v11 = vadd.f32 %v618_v9, %v469_v4  ;;  %v641_v12 = vadd.f32 %v638_v10, %v492_v7 }
 0x258   : > { %vm642_vm15 = vcmp.ge.f32.partialorder %v640_v11, 0.0  ;;  %vm643_vm0 = vcmp.ge.f32.partialorder %v641_v12, 0.0  ;;  %v644_v5 = vmul.f32 0.01, %v640_v11  ;;  %v645_v13 = vmul.f32 0.01, %v641_v12 }
 0x25a   : > { %v646_v14 = vsel %vm642_vm15, %v640_v11, %v644_v5  ;;  %v647_v15 = vsel %vm643_vm0, %v641_v12, %v645_v13 }
 0x25b   : > { %648 = vst [vmem:[%s251_s30] sm:$0x3f] %v646_v14 }
 0x25c   : > { %649 = vst [vmem:[%s251_s30 + $0x8] sm:$0x3f] %v647_v15 }
 0x25d PF: > { %s16_s21 = sadd.s32 1, %s785_s21  }
 0x25e   : > { %p13_p4 = scmp.ge.s32.totalorder %s16_s21, 4  }
 0x260   :  { %15 = sbr.rel (!%p13_p4) target bundleno = 1 (0x1), region = 74 }

</bundles_post_ra>
